<compile_context>
chip_gen: v7x
topology: tpu7x:2x2x1
jax: 0.10.0
libtpu: 0.0.40
codegen_flags: <defaults>
</compile_context>

<pallas_src>
from functools import partial

import jax
import jax.numpy as jnp
from jax.experimental import pallas as pl
from jax.experimental.pallas import tpu as pltpu


def _choose_q_tile(lq, dtype, max_tile=256):
    """Prefer MXU-friendly 256/128 tiles, else the largest sublane-packing
    multiple dividing Lq, else the full length."""
    if lq <= max_tile:
        return lq
    for t in (256, 128):
        if t <= max_tile and lq % t == 0:
            return t
    packing = max(1, 4 // jnp.dtype(dtype).itemsize)      # 1 f32, 2 bf16, 4 int8
    sub = 8 * packing
    start = (max_tile // sub) * sub
    for t in range(start, sub - 1, -sub):
        if lq % t == 0:
            return t
    return lq


def _nbytes(shape, dtype):
    n = 1
    for s in shape:
        n *= int(s)
    return n * jnp.dtype(dtype).itemsize


def _pick_vmem_limit(footprint_bytes):
    """Scoped-VMEM request: enough for our buffers + in-kernel temporaries, but
    always with headroom below physical capacity (64 MiB/TC on v7x)."""
    try:
        cap = int(pltpu.get_tpu_info().vmem_capacity_bytes)
    except Exception:
        cap = 64 * 1024 * 1024                             # conservative (v7x)
    want = 2 * footprint_bytes + (8 << 20)
    return int(max(32 << 20, min(want, cap - (8 << 20))))


def _attention_kernel(xq_ref, xkv_ref, wq_ref, wkv_ref, wo_ref, qnw_ref, knw_ref,
                      o_ref, kT_scr, v_scr,
                      *, num_heads, head_dim, eps, sm_scale):
    """One (batch, q-tile) grid step.

    Refs (leading batch dim squeezed by the BlockSpecs):
      xq_ref : (TQ,  Dq)        input dtype
      xkv_ref: (Lkv, Dkv)       input dtype
      wq_ref : (Dq,  inner)
      wkv_ref: (Dkv, 2*inner)   fused K|V projection weight
      wo_ref : (inner, Dq_pad)  output projection weight (lane-dense padded)
      qnw_ref/knw_ref: (1, inner) RMSNorm scales
      o_ref  : (TQ, Dq_pad)     lane-dense output tile
      kT_scr : (inner, Lkv)     VMEM, per-batch K pre-transposed
      v_scr  : (Lkv, inner)     VMEM, per-batch V
    """
    inner = num_heads * head_dim
    qi = pl.program_id(1)
    compute_dtype = v_scr.dtype

    # ---- K/V projection + K RMSNorm: once per batch element (first q tile). ----
    # NOTE: relies on grid axis 1 being sequential ("arbitrary") and on VMEM
    # scratch persisting across grid steps; never mark that axis "parallel".
    @pl.when(qi == 0)
    def _compute_kv():
        kv = jnp.dot(xkv_ref[...], wkv_ref[...],
                     preferred_element_type=jnp.float32)       # (Lkv, 2*inner)
        k = kv[:, :inner]
        v = kv[:, inner:]
        ms = jnp.mean(k * k, axis=-1, keepdims=True)           # RMSNorm over inner
        k = (k * jax.lax.rsqrt(ms + eps)) * knw_ref[...]
        # Transpose K once per batch (amortized over q tiles): per-head score is
        # then a plain A @ B and the scratch lane dim is Lkv (dense stores).
        kT_scr[...] = k.T.astype(compute_dtype)                # (inner, Lkv)
        v_scr[...] = v.astype(compute_dtype)                   # (Lkv, inner)

    # ---- Q projection + RMSNorm; fold norm weight and 1/sqrt(hd) into q. ----
    q = jnp.dot(xq_ref[...], wq_ref[...], preferred_element_type=jnp.float32)
    ms_q = jnp.mean(q * q, axis=-1, keepdims=True)
    q = (q * jax.lax.rsqrt(ms_q + eps)) * (qnw_ref[...] * sm_scale)
    q = q.astype(compute_dtype)                                # (TQ, inner)

    # ---- Per-head score/softmax/PV: bounds the live f32 score to (TQ, Lkv). ----
    # TODO(synk): for very long Lkv this would additionally want flash-style
    # Lkv tiling (online softmax) instead of full-Lkv K/V scratch.
    pv_heads = []
    for h in range(num_heads):
        lo = h * head_dim
        hi = lo + head_dim
        s = jnp.dot(q[:, lo:hi], kT_scr[lo:hi, :],
                    preferred_element_type=jnp.float32)        # (TQ, Lkv) f32
        m = jnp.max(s, axis=-1, keepdims=True)
        e = jnp.exp(s - m)
        denom = jnp.sum(e, axis=-1, keepdims=True)
        p = (e * pl.reciprocal(denom, approx=True)).astype(compute_dtype)
        pv_heads.append(jnp.dot(p, v_scr[:, lo:hi],
                                preferred_element_type=jnp.float32))   # (TQ, hd)

    # ---- Output projection: ONE deep-contraction matmul (depth = inner). ----
    pv = jnp.concatenate(pv_heads, axis=-1)                    # (TQ, inner) f32
    o_ref[...] = jnp.dot(pv.astype(wo_ref.dtype), wo_ref[...],
                         preferred_element_type=jnp.float32).astype(o_ref.dtype)


def prepare_attention_params(params, *, num_heads, head_dim):
    """One-time parameter preprocessing (hoisted out of the per-step forward):
    fuse K|V weights, pad the output projection to a lane-dense multiple of 128,
    reshape the norm scales."""
    inner = num_heads * head_dim
    dq = params["wo_t"].shape[1]
    dq_pad = ((dq + 127) // 128) * 128
    wo_t = params["wo_t"]
    if dq_pad != dq:
        wo_t = jnp.pad(wo_t, ((0, 0), (0, dq_pad - dq)))
    return {
        "wq_t": params["wq_t"],                                        # (Dq, inner)
        "wkv_t": jnp.concatenate([params["wk_t"], params["wv_t"]], 1),  # (Dkv, 2*inner)
        "wo_pad": wo_t,                                                # (inner, Dq_pad)
        "q_norm_w": params["q_norm_w"].reshape(1, inner),
        "k_norm_w": params["k_norm_w"].reshape(1, inner),
        "dq": dq,
        "dq_pad": dq_pad,
    }


def attention_forward(inputs_q, inputs_kv, prepared, *, num_heads, head_dim,
                      eps=1e-6, q_tile=None, max_q_tile=256):
    """Pallas equivalent of Attention.forward(inputs_q, inputs_kv), eval path.

    # TODO(synk): attention_mask / rope_pos_embed / dropout branches are not
    # wired into the kernel; only the default (None / eval) path is implemented.
    """
    if inputs_kv is None:
        inputs_kv = inputs_q
    B, Lq, Dq = inputs_q.shape
    _, Lkv, Dkv = inputs_kv.shape
    inner = num_heads * head_dim
    dq_pad = prepared["dq_pad"]
    assert prepared["dq"] == Dq

    compute_dtype = inputs_q.dtype
    if q_tile is None:
        # On v6e/v5e (128 MiB VMEM) max_q_tile=512 can be profitable; keep 256 on v7x.
        q_tile = _choose_q_tile(Lq, compute_dtype, max_tile=max_q_tile)
    assert Lq % q_tile == 0
    num_q = Lq // q_tile
    sm_scale = 1.0 / (head_dim ** 0.5)

    wq_t = prepared["wq_t"]
    wkv_t = prepared["wkv_t"]
    wo_pad = prepared["wo_pad"]
    qnw = prepared["q_norm_w"]
    knw = prepared["k_norm_w"]

    # VMEM footprint: double-buffered xq/out tiles, single-buffered constants
    # and xkv, plus K^T / V scratch.
    footprint = (
        2 * _nbytes((q_tile, Dq), compute_dtype)
        + _nbytes((Lkv, Dkv), compute_dtype)
        + _nbytes(wq_t.shape, wq_t.dtype)
        + _nbytes(wkv_t.shape, wkv_t.dtype)
        + _nbytes(wo_pad.shape, wo_pad.dtype)
        + 2 * _nbytes((1, inner), qnw.dtype)
        + 2 * _nbytes((q_tile, dq_pad), compute_dtype)
        + 2 * _nbytes((Lkv, inner), compute_dtype)
    )

    single = pl.Buffered(1)   # constant-index blocks: no need to double-buffer

    kernel = partial(_attention_kernel, num_heads=num_heads, head_dim=head_dim,
                     eps=eps, sm_scale=sm_scale)

    out = pl.pallas_call(
        kernel,
        out_shape=jax.ShapeDtypeStruct((B, Lq, dq_pad), compute_dtype),
        grid_spec=pltpu.PrefetchScalarGridSpec(
            num_scalar_prefetch=0,
            grid=(B, num_q),
            in_specs=[
                pl.BlockSpec((None, q_tile, Dq), lambda b, qi: (b, qi, 0)),
                pl.BlockSpec((None, Lkv, Dkv), lambda b, qi: (b, 0, 0),
                             pipeline_mode=single),
                pl.BlockSpec((Dq, inner), lambda b, qi: (0, 0),
                             pipeline_mode=single),
                pl.BlockSpec((Dkv, 2 * inner), lambda b, qi: (0, 0),
                             pipeline_mode=single),
                pl.BlockSpec((inner, dq_pad), lambda b, qi: (0, 0),
                             pipeline_mode=single),
                pl.BlockSpec((1, inner), lambda b, qi: (0, 0),
                             pipeline_mode=single),
                pl.BlockSpec((1, inner), lambda b, qi: (0, 0),
                             pipeline_mode=single),
            ],
            out_specs=pl.BlockSpec((None, q_tile, dq_pad), lambda b, qi: (b, qi, 0)),
            scratch_shapes=[
                pltpu.VMEM((inner, Lkv), compute_dtype),   # K^T (pre-transposed)
                pltpu.VMEM((Lkv, inner), compute_dtype),   # V
            ],
        ),
        compiler_params=pltpu.CompilerParams(
            # batch axis parallel (megacore / 2-TC sharding); the q-tile axis
            # MUST stay "arbitrary": K/V scratch is written at qi == 0 and
            # reused across the remaining q tiles of that batch element.
            dimension_semantics=("parallel", "arbitrary"),
            vmem_limit_bytes=_pick_vmem_limit(footprint),
        ),
    )(inputs_q, inputs_kv, wq_t, wkv_t, wo_pad, qnw, knw)

    if dq_pad != Dq:
        out = out[:, :, :Dq]
    return out


# ---------------------------------------------------------------------------
# Pure-JAX reference mirroring the PyTorch forward (for correctness check).
# ---------------------------------------------------------------------------
def attention_reference(inputs_q, inputs_kv, params, *, num_heads, head_dim, eps=1e-6):
    if inputs_kv is None:
        inputs_kv = inputs_q
    B, Lq, _ = inputs_q.shape
    _, Lkv, _ = inputs_kv.shape
    inner = num_heads * head_dim

    q = inputs_q @ params["wq_t"]
    k = inputs_kv @ params["wk_t"]
    v = inputs_kv @ params["wv_t"]

    def rmsnorm(x, w):
        ms = jnp.mean(x.astype(jnp.float32) ** 2, axis=-1, keepdims=True)
        return (w * (x.astype(jnp.float32) * jax.lax.rsqrt(ms + eps))).astype(x.dtype)

    q = rmsnorm(q, params["q_norm_w"])
    k = rmsnorm(k, params["k_norm_w"])

    q = q.reshape(B, Lq, num_heads, head_dim).transpose(0, 2, 1, 3)
    k = k.reshape(B, Lkv, num_heads, head_dim).transpose(0, 2, 1, 3)
    v = v.reshape(B, Lkv, num_heads, head_dim).transpose(0, 2, 1, 3)

    scale = 1.0 / (head_dim ** 0.5)
    s = jnp.einsum("bhqd,bhkd->bhqk", q, k) * scale
    p = jax.nn.softmax(s, axis=-1)
    o = jnp.einsum("bhqk,bhkd->bhqd", p, v)
    o = o.transpose(0, 2, 1, 3).reshape(B, Lq, inner)
    return o @ params["wo_t"]


if __name__ == "__main__":
    # Small shapes consistent with the module: batch=2, seq=8, q_dim=kv_dim=32,
    # heads=4, dim_head=16 -> inner_dim=64.
    B, L = 2, 8
    q_dim = kv_dim = 32
    heads, dim_head = 4, 16
    inner = heads * dim_head

    key = jax.random.PRNGKey(0)
    keys = jax.random.split(key, 8)

    params = {
        # nn.Linear weight is [out, in]; we store the transpose [in, out].
        "wq_t": (0.02 * jax.random.normal(keys[0], (q_dim, inner))).astype(jnp.float32),
        "wk_t": (0.02 * jax.random.normal(keys[1], (kv_dim, inner))).astype(jnp.float32),
        "wv_t": (0.02 * jax.random.normal(keys[2], (kv_dim, inner))).astype(jnp.float32),
        "wo_t": (0.02 * jax.random.normal(keys[3], (inner, q_dim))).astype(jnp.float32),
        # RMSNorm weights init to ones; perturb so the scale multiply is exercised.
        "q_norm_w": (1.0 + 0.1 * jax.random.normal(keys[4], (inner,))).astype(jnp.float32),
        "k_norm_w": (1.0 + 0.1 * jax.random.normal(keys[5], (inner,))).astype(jnp.float32),
    }

    inputs_q = jax.random.normal(keys[6], (B, L, q_dim), dtype=jnp.float32)
    inputs_kv = jax.random.normal(keys[7], (B, L, kv_dim), dtype=jnp.float32)

    # One-time parameter preprocessing (hoisted out of the per-step forward).
    prepared = prepare_attention_params(params, num_heads=heads, head_dim=dim_head)

    out = attention_forward(inputs_q, inputs_kv, prepared,
                            num_heads=heads, head_dim=dim_head)
    out = jax.block_until_ready(out)

    ref = attention_reference(inputs_q, inputs_kv, params,
                              num_heads=heads, head_dim=dim_head)
    ref = jax.block_until_ready(ref)

    assert out.shape == (B, L, q_dim)
    # Tolerance accounts for the EUP approximate reciprocal in the softmax.
    assert jnp.allclose(out, ref, atol=3e-4, rtol=1e-2), "mismatch vs reference"
    print("KERNEL_OK")
</pallas_src>

<mosaic_0001>
module attributes {stable_mosaic.version = 11 : i64} {
  func.func @_attention_kernel(%arg0: i32, %arg1: i32, %arg2: memref<1x8x32xf32, #tpu.memory_space<vmem>>, %arg3: memref<1x8x32xf32, #tpu.memory_space<vmem>>, %arg4: memref<32x64xf32, #tpu.memory_space<vmem>>, %arg5: memref<32x128xf32, #tpu.memory_space<vmem>>, %arg6: memref<64x128xf32, #tpu.memory_space<vmem>>, %arg7: memref<1x64xf32, #tpu.memory_space<vmem>>, %arg8: memref<1x64xf32, #tpu.memory_space<vmem>>, %arg9: memref<1x8x128xf32, #tpu.memory_space<vmem>>, %arg10: memref<64x8xf32, #tpu.memory_space<vmem>>, %arg11: memref<8x64xf32, #tpu.memory_space<vmem>>) attributes {dimension_semantics = [#tpu.dimension_semantics<parallel>, #tpu.dimension_semantics<arbitrary>], iteration_bounds = array<i64: 2, 1>, scalar_prefetch = 0 : i64, scratch_operands = 2 : i64, tpu.core_type = #tpu.core_type<tc>, window_params = [{transform_indices = @transform_0, window_bounds = array<i64: 1, 8, 32>}, {pipeline_mode = #tpu.pipeline_mode<synchronous>, transform_indices = @transform_1, window_bounds = array<i64: 1, 8, 32>}, {pipeline_mode = #tpu.pipeline_mode<synchronous>, transform_indices = @transform_2, window_bounds = array<i64: 32, 64>}, {pipeline_mode = #tpu.pipeline_mode<synchronous>, transform_indices = @transform_3, window_bounds = array<i64: 32, 128>}, {pipeline_mode = #tpu.pipeline_mode<synchronous>, transform_indices = @transform_4, window_bounds = array<i64: 64, 128>}, {pipeline_mode = #tpu.pipeline_mode<synchronous>, transform_indices = @transform_5, window_bounds = array<i64: 1, 64>}, {pipeline_mode = #tpu.pipeline_mode<synchronous>, transform_indices = @transform_6, window_bounds = array<i64: 1, 64>}, {transform_indices = @transform_7, window_bounds = array<i64: 1, 8, 128>}]} {
    %c0_i32 = arith.constant 0 : i32
    %0 = arith.cmpi eq, %arg1, %c0_i32 : i32
    %1 = arith.extui %0 : i1 to i32
    %c0_i32_0 = arith.constant 0 : i32
    %2 = arith.cmpi ne, %1, %c0_i32_0 : i32
    scf.if %2 {
      %c0_46 = arith.constant 0 : index
      %c0_47 = arith.constant 0 : index
      %c0_48 = arith.constant 0 : index
      %88 = vector.load %arg3[%c0_46, %c0_47, %c0_48] : memref<1x8x32xf32, #tpu.memory_space<vmem>>, vector<1x8x32xf32>
      %89 = vector.shape_cast %88 : vector<1x8x32xf32> to vector<8x32xf32>
      %c0_49 = arith.constant 0 : index
      %c0_50 = arith.constant 0 : index
      %90 = vector.load %arg5[%c0_49, %c0_50] : memref<32x128xf32, #tpu.memory_space<vmem>>, vector<32x128xf32>
      %cst_51 = arith.constant dense<0.000000e+00> : vector<8x128xf32>
      %91 = tpu.matmul %89, %90, %cst_51 {dimension_numbers = #tpu.dot_dimension_numbers<[1], [0], [0], [1], [0, 0, 1, 1], [], []>} : vector<8x32xf32>, vector<32x128xf32>, vector<8x128xf32> -> vector<8x128xf32>
      %92 = vector.extract_strided_slice %91 {offsets = [0, 0], sizes = [8, 64], strides = [1, 1]} : vector<8x128xf32> to vector<8x64xf32>
      %93 = vector.extract_strided_slice %91 {offsets = [0, 64], sizes = [8, 64], strides = [1, 1]} : vector<8x128xf32> to vector<8x64xf32>
      %94 = arith.mulf %92, %92 : vector<8x64xf32>
      %cst_52 = arith.constant dense<0.000000e+00> : vector<8xf32>
      %95 = vector.multi_reduction <add>, %94, %cst_52 [1] : vector<8x64xf32> to vector<8xf32>
      %96 = vector.shape_cast %95 : vector<8xf32> to vector<8x1xf32>
      %cst_53 = arith.constant 6.400000e+01 : f32
      %97 = vector.broadcast %cst_53 : f32 to vector<8x1xf32>
      %98 = arith.divf %96, %97 : vector<8x1xf32>
      %cst_54 = arith.constant 9.99999997E-7 : f32
      %99 = vector.broadcast %cst_54 : f32 to vector<8x1xf32>
      %100 = arith.addf %98, %99 : vector<8x1xf32>
      %101 = math.rsqrt %100 : vector<8x1xf32>
      %102 = vector.broadcast %101 : vector<8x1xf32> to vector<8x64xf32>
      %103 = arith.mulf %92, %102 : vector<8x64xf32>
      %c0_55 = arith.constant 0 : index
      %c0_56 = arith.constant 0 : index
      %104 = vector.load %arg8[%c0_55, %c0_56] : memref<1x64xf32, #tpu.memory_space<vmem>>, vector<1x64xf32>
      %105 = vector.broadcast %104 : vector<1x64xf32> to vector<8x64xf32>
      %106 = arith.mulf %103, %105 : vector<8x64xf32>
      %107 = tpu.transpose %106, [1, 0] : vector<8x64xf32> -> vector<64x8xf32>
      %c0_57 = arith.constant 0 : index
      %c0_58 = arith.constant 0 : index
      %108 = vector.load %arg10[%c0_57, %c0_58] : memref<64x8xf32, #tpu.memory_space<vmem>>, vector<64x8xf32>
      tpu.vector_store %arg10[%c0_57, %c0_58], %107 {strides = array<i32>} : memref<64x8xf32, #tpu.memory_space<vmem>>, vector<64x8xf32>,
      %c0_59 = arith.constant 0 : index
      %c0_60 = arith.constant 0 : index
      %109 = vector.load %arg11[%c0_59, %c0_60] : memref<8x64xf32, #tpu.memory_space<vmem>>, vector<8x64xf32>
      tpu.vector_store %arg11[%c0_59, %c0_60], %93 {strides = array<i32>} : memref<8x64xf32, #tpu.memory_space<vmem>>, vector<8x64xf32>,
    } else {
    }
    %c0 = arith.constant 0 : index
    %c0_1 = arith.constant 0 : index
    %c0_2 = arith.constant 0 : index
    %3 = vector.load %arg2[%c0, %c0_1, %c0_2] : memref<1x8x32xf32, #tpu.memory_space<vmem>>, vector<1x8x32xf32>
    %4 = vector.shape_cast %3 : vector<1x8x32xf32> to vector<8x32xf32>
    %c0_3 = arith.constant 0 : index
    %c0_4 = arith.constant 0 : index
    %5 = vector.load %arg4[%c0_3, %c0_4] : memref<32x64xf32, #tpu.memory_space<vmem>>, vector<32x64xf32>
    %cst = arith.constant dense<0.000000e+00> : vector<8x64xf32>
    %6 = tpu.matmul %4, %5, %cst {dimension_numbers = #tpu.dot_dimension_numbers<[1], [0], [0], [1], [0, 0, 1, 1], [], []>} : vector<8x32xf32>, vector<32x64xf32>, vector<8x64xf32> -> vector<8x64xf32>
    %7 = arith.mulf %6, %6 : vector<8x64xf32>
    %cst_5 = arith.constant dense<0.000000e+00> : vector<8xf32>
    %8 = vector.multi_reduction <add>, %7, %cst_5 [1] : vector<8x64xf32> to vector<8xf32>
    %9 = vector.shape_cast %8 : vector<8xf32> to vector<8x1xf32>
    %cst_6 = arith.constant 6.400000e+01 : f32
    %10 = vector.broadcast %cst_6 : f32 to vector<8x1xf32>
    %11 = arith.divf %9, %10 : vector<8x1xf32>
    %cst_7 = arith.constant 9.99999997E-7 : f32
    %12 = vector.broadcast %cst_7 : f32 to vector<8x1xf32>
    %13 = arith.addf %11, %12 : vector<8x1xf32>
    %14 = math.rsqrt %13 : vector<8x1xf32>
    %15 = vector.broadcast %14 : vector<8x1xf32> to vector<8x64xf32>
    %16 = arith.mulf %6, %15 : vector<8x64xf32>
    %c0_8 = arith.constant 0 : index
    %c0_9 = arith.constant 0 : index
    %17 = vector.load %arg7[%c0_8, %c0_9] : memref<1x64xf32, #tpu.memory_space<vmem>>, vector<1x64xf32>
    %cst_10 = arith.constant 2.500000e-01 : f32
    %18 = vector.broadcast %cst_10 : f32 to vector<1x64xf32>
    %19 = arith.mulf %17, %18 : vector<1x64xf32>
    %20 = vector.broadcast %19 : vector<1x64xf32> to vector<8x64xf32>
    %21 = arith.mulf %16, %20 : vector<8x64xf32>
    %22 = vector.extract_strided_slice %21 {offsets = [0, 0], sizes = [8, 16], strides = [1, 1]} : vector<8x64xf32> to vector<8x16xf32>
    %c0_11 = arith.constant 0 : index
    %c0_12 = arith.constant 0 : index
    %23 = vector.load %arg10[%c0_11, %c0_12] : memref<64x8xf32, #tpu.memory_space<vmem>>, vector<16x8xf32>
    %cst_13 = arith.constant dense<0.000000e+00> : vector<8x8xf32>
    %24 = tpu.matmul %22, %23, %cst_13 {dimension_numbers = #tpu.dot_dimension_numbers<[1], [0], [0], [1], [0, 0, 1, 1], [], []>} : vector<8x16xf32>, vector<16x8xf32>, vector<8x8xf32> -> vector<8x8xf32>
    %cst_14 = arith.constant dense<0xFF800000> : vector<8xf32>
    %25 = vector.multi_reduction <maximumf>, %24, %cst_14 [1] : vector<8x8xf32> to vector<8xf32>
    %26 = vector.shape_cast %25 : vector<8xf32> to vector<8x1xf32>
    %27 = vector.broadcast %26 : vector<8x1xf32> to vector<8x8xf32>
    %28 = arith.subf %24, %27 : vector<8x8xf32>
    %29 = math.exp %28 : vector<8x8xf32>
    %cst_15 = arith.constant dense<0.000000e+00> : vector<8xf32>
    %30 = vector.multi_reduction <add>, %29, %cst_15 [1] : vector<8x8xf32> to vector<8xf32>
    %31 = vector.shape_cast %30 : vector<8xf32> to vector<8x1xf32>
    %32 = tpu.reciprocal %31 {approx = true} : vector<8x1xf32> -> vector<8x1xf32>
    %33 = vector.broadcast %32 : vector<8x1xf32> to vector<8x8xf32>
    %34 = arith.mulf %29, %33 : vector<8x8xf32>
    %c0_16 = arith.constant 0 : index
    %c0_17 = arith.constant 0 : index
    %35 = vector.load %arg11[%c0_16, %c0_17] : memref<8x64xf32, #tpu.memory_space<vmem>>, vector<8x16xf32>
    %cst_18 = arith.constant dense<0.000000e+00> : vector<8x16xf32>
    %36 = tpu.matmul %34, %35, %cst_18 {dimension_numbers = #tpu.dot_dimension_numbers<[1], [0], [0], [1], [0, 0, 1, 1], [], []>} : vector<8x8xf32>, vector<8x16xf32>, vector<8x16xf32> -> vector<8x16xf32>
    %37 = vector.extract_strided_slice %21 {offsets = [0, 16], sizes = [8, 16], strides = [1, 1]} : vector<8x64xf32> to vector<8x16xf32>
    %c16 = arith.constant 16 : index
    %c0_19 = arith.constant 0 : index
    %38 = vector.load %arg10[%c16, %c0_19] : memref<64x8xf32, #tpu.memory_space<vmem>>, vector<16x8xf32>
    %cst_20 = arith.constant dense<0.000000e+00> : vector<8x8xf32>
    %39 = tpu.matmul %37, %38, %cst_20 {dimension_numbers = #tpu.dot_dimension_numbers<[1], [0], [0], [1], [0, 0, 1, 1], [], []>} : vector<8x16xf32>, vector<16x8xf32>, vector<8x8xf32> -> vector<8x8xf32>
    %cst_21 = arith.constant dense<0xFF800000> : vector<8xf32>
    %40 = vector.multi_reduction <maximumf>, %39, %cst_21 [1] : vector<8x8xf32> to vector<8xf32>
    %41 = vector.shape_cast %40 : vector<8xf32> to vector<8x1xf32>
    %42 = vector.broadcast %41 : vector<8x1xf32> to vector<8x8xf32>
    %43 = arith.subf %39, %42 : vector<8x8xf32>
    %44 = math.exp %43 : vector<8x8xf32>
    %cst_22 = arith.constant dense<0.000000e+00> : vector<8xf32>
    %45 = vector.multi_reduction <add>, %44, %cst_22 [1] : vector<8x8xf32> to vector<8xf32>
    %46 = vector.shape_cast %45 : vector<8xf32> to vector<8x1xf32>
    %47 = tpu.reciprocal %46 {approx = true} : vector<8x1xf32> -> vector<8x1xf32>
    %48 = vector.broadcast %47 : vector<8x1xf32> to vector<8x8xf32>
    %49 = arith.mulf %44, %48 : vector<8x8xf32>
    %c0_23 = arith.constant 0 : index
    %c16_24 = arith.constant 16 : index
    %50 = vector.load %arg11[%c0_23, %c16_24] : memref<8x64xf32, #tpu.memory_space<vmem>>, vector<8x16xf32>
    %cst_25 = arith.constant dense<0.000000e+00> : vector<8x16xf32>
    %51 = tpu.matmul %49, %50, %cst_25 {dimension_numbers = #tpu.dot_dimension_numbers<[1], [0], [0], [1], [0, 0, 1, 1], [], []>} : vector<8x8xf32>, vector<8x16xf32>, vector<8x16xf32> -> vector<8x16xf32>
    %52 = vector.extract_strided_slice %21 {offsets = [0, 32], sizes = [8, 16], strides = [1, 1]} : vector<8x64xf32> to vector<8x16xf32>
    %c32 = arith.constant 32 : index
    %c0_26 = arith.constant 0 : index
    %53 = vector.load %arg10[%c32, %c0_26] : memref<64x8xf32, #tpu.memory_space<vmem>>, vector<16x8xf32>
    %cst_27 = arith.constant dense<0.000000e+00> : vector<8x8xf32>
    %54 = tpu.matmul %52, %53, %cst_27 {dimension_numbers = #tpu.dot_dimension_numbers<[1], [0], [0], [1], [0, 0, 1, 1], [], []>} : vector<8x16xf32>, vector<16x8xf32>, vector<8x8xf32> -> vector<8x8xf32>
    %cst_28 = arith.constant dense<0xFF800000> : vector<8xf32>
    %55 = vector.multi_reduction <maximumf>, %54, %cst_28 [1] : vector<8x8xf32> to vector<8xf32>
    %56 = vector.shape_cast %55 : vector<8xf32> to vector<8x1xf32>
    %57 = vector.broadcast %56 : vector<8x1xf32> to vector<8x8xf32>
    %58 = arith.subf %54, %57 : vector<8x8xf32>
    %59 = math.exp %58 : vector<8x8xf32>
    %cst_29 = arith.constant dense<0.000000e+00> : vector<8xf32>
    %60 = vector.multi_reduction <add>, %59, %cst_29 [1] : vector<8x8xf32> to vector<8xf32>
    %61 = vector.shape_cast %60 : vector<8xf32> to vector<8x1xf32>
    %62 = tpu.reciprocal %61 {approx = true} : vector<8x1xf32> -> vector<8x1xf32>
    %63 = vector.broadcast %62 : vector<8x1xf32> to vector<8x8xf32>
    %64 = arith.mulf %59, %63 : vector<8x8xf32>
    %c0_30 = arith.constant 0 : index
    %c32_31 = arith.constant 32 : index
    %65 = vector.load %arg11[%c0_30, %c32_31] : memref<8x64xf32, #tpu.memory_space<vmem>>, vector<8x16xf32>
    %cst_32 = arith.constant dense<0.000000e+00> : vector<8x16xf32>
    %66 = tpu.matmul %64, %65, %cst_32 {dimension_numbers = #tpu.dot_dimension_numbers<[1], [0], [0], [1], [0, 0, 1, 1], [], []>} : vector<8x8xf32>, vector<8x16xf32>, vector<8x16xf32> -> vector<8x16xf32>
    %67 = vector.extract_strided_slice %21 {offsets = [0, 48], sizes = [8, 16], strides = [1, 1]} : vector<8x64xf32> to vector<8x16xf32>
    %c48 = arith.constant 48 : index
    %c0_33 = arith.constant 0 : index
    %68 = vector.load %arg10[%c48, %c0_33] : memref<64x8xf32, #tpu.memory_space<vmem>>, vector<16x8xf32>
    %cst_34 = arith.constant dense<0.000000e+00> : vector<8x8xf32>
    %69 = tpu.matmul %67, %68, %cst_34 {dimension_numbers = #tpu.dot_dimension_numbers<[1], [0], [0], [1], [0, 0, 1, 1], [], []>} : vector<8x16xf32>, vector<16x8xf32>, vector<8x8xf32> -> vector<8x8xf32>
    %cst_35 = arith.constant dense<0xFF800000> : vector<8xf32>
    %70 = vector.multi_reduction <maximumf>, %69, %cst_35 [1] : vector<8x8xf32> to vector<8xf32>
    %71 = vector.shape_cast %70 : vector<8xf32> to vector<8x1xf32>
    %72 = vector.broadcast %71 : vector<8x1xf32> to vector<8x8xf32>
    %73 = arith.subf %69, %72 : vector<8x8xf32>
    %74 = math.exp %73 : vector<8x8xf32>
    %cst_36 = arith.constant dense<0.000000e+00> : vector<8xf32>
    %75 = vector.multi_reduction <add>, %74, %cst_36 [1] : vector<8x8xf32> to vector<8xf32>
    %76 = vector.shape_cast %75 : vector<8xf32> to vector<8x1xf32>
    %77 = tpu.reciprocal %76 {approx = true} : vector<8x1xf32> -> vector<8x1xf32>
    %78 = vector.broadcast %77 : vector<8x1xf32> to vector<8x8xf32>
    %79 = arith.mulf %74, %78 : vector<8x8xf32>
    %c0_37 = arith.constant 0 : index
    %c48_38 = arith.constant 48 : index
    %80 = vector.load %arg11[%c0_37, %c48_38] : memref<8x64xf32, #tpu.memory_space<vmem>>, vector<8x16xf32>
    %cst_39 = arith.constant dense<0.000000e+00> : vector<8x16xf32>
    %81 = tpu.matmul %79, %80, %cst_39 {dimension_numbers = #tpu.dot_dimension_numbers<[1], [0], [0], [1], [0, 0, 1, 1], [], []>} : vector<8x8xf32>, vector<8x16xf32>, vector<8x16xf32> -> vector<8x16xf32>
    %82 = tpu.concatenate %36, %51, %66, %81 in 1 : vector<8x16xf32>, vector<8x16xf32>, vector<8x16xf32>, vector<8x16xf32> -> vector<8x64xf32>
    %c0_40 = arith.constant 0 : index
    %c0_41 = arith.constant 0 : index
    %83 = vector.load %arg6[%c0_40, %c0_41] : memref<64x128xf32, #tpu.memory_space<vmem>>, vector<64x128xf32>
    %cst_42 = arith.constant dense<0.000000e+00> : vector<8x128xf32>
    %84 = tpu.matmul %82, %83, %cst_42 {dimension_numbers = #tpu.dot_dimension_numbers<[1], [0], [0], [1], [0, 0, 1, 1], [], []>} : vector<8x64xf32>, vector<64x128xf32>, vector<8x128xf32> -> vector<8x128xf32>
    %c0_43 = arith.constant 0 : index
    %c0_44 = arith.constant 0 : index
    %c0_45 = arith.constant 0 : index
    %85 = vector.load %arg9[%c0_43, %c0_44, %c0_45] : memref<1x8x128xf32, #tpu.memory_space<vmem>>, vector<1x8x128xf32>
    %86 = vector.shape_cast %85 : vector<1x8x128xf32> to vector<8x128xf32>
    %87 = vector.shape_cast %84 : vector<8x128xf32> to vector<1x8x128xf32>
    tpu.vector_store %arg9[%c0_43, %c0_44, %c0_45], %87 {strides = array<i32>} : memref<1x8x128xf32, #tpu.memory_space<vmem>>, vector<1x8x128xf32>,
    return
  }
  func.func @transform_0(%arg0: i32, %arg1: i32) -> (i32, i32, i32) {
    %c0_i32 = arith.constant 0 : i32
    %c0_i32_0 = arith.constant 0 : i32
    return %arg0, %arg1, %c0_i32 : i32, i32, i32
  }
  func.func @transform_1(%arg0: i32, %arg1: i32) -> (i32, i32, i32) {
    %c0_i32 = arith.constant 0 : i32
    %c0_i32_0 = arith.constant 0 : i32
    %c0_i32_1 = arith.constant 0 : i32
    return %arg0, %c0_i32, %c0_i32_0 : i32, i32, i32
  }
  func.func @transform_2(%arg0: i32, %arg1: i32) -> (i32, i32) {
    %c0_i32 = arith.constant 0 : i32
    %c0_i32_0 = arith.constant 0 : i32
    %c0_i32_1 = arith.constant 0 : i32
    return %c0_i32, %c0_i32_0 : i32, i32
  }
  func.func @transform_3(%arg0: i32, %arg1: i32) -> (i32, i32) {
    %c0_i32 = arith.constant 0 : i32
    %c0_i32_0 = arith.constant 0 : i32
    %c0_i32_1 = arith.constant 0 : i32
    return %c0_i32, %c0_i32_0 : i32, i32
  }
  func.func @transform_4(%arg0: i32, %arg1: i32) -> (i32, i32) {
    %c0_i32 = arith.constant 0 : i32
    %c0_i32_0 = arith.constant 0 : i32
    %c0_i32_1 = arith.constant 0 : i32
    return %c0_i32, %c0_i32_0 : i32, i32
  }
  func.func @transform_5(%arg0: i32, %arg1: i32) -> (i32, i32) {
    %c0_i32 = arith.constant 0 : i32
    %c0_i32_0 = arith.constant 0 : i32
    %c0_i32_1 = arith.constant 0 : i32
    return %c0_i32, %c0_i32_0 : i32, i32
  }
  func.func @transform_6(%arg0: i32, %arg1: i32) -> (i32, i32) {
    %c0_i32 = arith.constant 0 : i32
    %c0_i32_0 = arith.constant 0 : i32
    %c0_i32_1 = arith.constant 0 : i32
    return %c0_i32, %c0_i32_0 : i32, i32
  }
  func.func @transform_7(%arg0: i32, %arg1: i32) -> (i32, i32, i32) {
    %c0_i32 = arith.constant 0 : i32
    %c0_i32_0 = arith.constant 0 : i32
    return %arg0, %arg1, %c0_i32 : i32, i32, i32
  }
}

</mosaic_0001>

<bundles_post_ra>
// kernel: tpu_custom_call.1
= control target key start
LH: loop header
LB: loop body
LE: loop exit
PB: predicated region body
PF: predicated region fallthrough
CT: control target
= control target key end

     0   :  { %s2531_s0 = inlined_call_operand.hbm [shape: f32[2,8,32], index: 0, kind: input, shape index: {}]   ;;  %s2532_s1 = inlined_call_operand.hbm [shape: f32[2,8,32], index: 1, kind: input, shape index: {}]   ;;  %s2533_s2 = inlined_call_operand.hbm [shape: f32[32,64], index: 2, kind: input, shape index: {}]   ;;  %s2534_s3 = inlined_call_operand.hbm [shape: f32[32,128], index: 3, kind: input, shape index: {}]   ;;  %s2535_s4 = inlined_call_operand.hbm [shape: f32[64,128], index: 4, kind: input, shape index: {}]   ;;  %s2536_s5 = inlined_call_operand.vmem [shape: f32[1,64], index: 5, kind: input, shape index: {}]   ;;  %s2537_s6 = inlined_call_operand.vmem [shape: f32[1,64], index: 6, kind: input, shape index: {}]   ;;  %s2538_s7 = inlined_call_operand.hbm [shape: f32[2,8,128], index: 7, kind: output, shape index: {}]  }
   0x1   :  { %2548 = sst [smem:[#allocation21_spill]] %s2532_s1 }
   0x2   :  { %2549 = sst [smem:[#allocation22_spill]] %s2534_s3 }
   0x3   :  { %12 = vsyncpa [#allocation5], 0 }
   0x4   :  { %14 = vsyncpa [#allocation5 + $0x1], 0 }
   0x5   :  { %15 = vsyncpa [#allocation8], 0 }
   0x6   :  { %16 = vsyncpa [#allocation11], 0 }
   0x7   :  { %17 = vsyncpa [#allocation6], 0 }
   0x8   :  { %19 = vsyncpa [#allocation6 + $0x1], 0  ;;  %s2129_s24 = smov 0   ;;  %s2131_s25 = smov 0  }
   0x9   :  { %s2133_s26 = smov 0   ;;  %s2135_s27 = smov 0  }
   0xa   :  { %s2137_s28 = smov 0   ;;  %s2139_s29 = smov 0  }
   0xb LB: > { %2550 = sst [smem:[#allocation19_spill]] %s2049_s24  ;;  %s1504_s30 = sadd.s32 4294967295, %s2069_s29   ;;  %s2069_s29 = sphi %s2139_s29, %s25_s29   ;;  %s2065_s28 = sphi %s2137_s28, %s2578_s28   ;;  %s2061_s27 = sphi %s2135_s27, %s2577_s27   ;;  %s2057_s26 = sphi %s2133_s26, %s2576_s26   ;;  %s2053_s25 = sphi %s2131_s25, %s2575_s25   ;;  %s2049_s24 = sphi %s2129_s24, %s2574_s24  }
   0xc   : > { %s1505_s8 = sadd.s32 4294967294, %s2069_s29   ;;  %p59_p0 = scmp.ne.s32.totalorder %s2053_s25, %s2049_s24 }
   0xd   : > { %p2163_p1 = scmp.eq.s32.totalorder %s1504_s30, 0  ;;  %p2167_p2 = scmp.eq.s32.totalorder %s1504_s30, 1 }
   0xe   : > { %p222_p3 = scmp.eq.s32.totalorder %s1505_s8, 1  ;;  %p1506_p5 = scmp.ge.s32.totalorder %s2069_s29, 1 }
   0xf   : > { %s2551_s9 = scalar_select %p2163_p1, 1, 0 }
  0x10   : > { %s2552_s10 = scalar_select %p2167_p2, 1, 0 }
  0x11   : > { %p2173_p4 = por %p2163_p1, %p59_p0  ;;  %p2178_p6 = por %p222_p3, %p59_p0 }
  0x12   : > { %p229_p7 = scmp.lt.s32.totalorder %s2069_s29, 3  ;;  %s2545_s13 = sshll.u32 %s2061_s27, 7 }
  0x13   : > { %s2553_s11 = scalar_select %p2173_p4, 1, 0 }
  0x14   : > { %s2554_s12 = scalar_select %p2178_p6, 1, 0 }
  0x15   : > { %p2184_p8 = pnand %p1506_p5, %p229_p7  ;;  %s2557_s1 = sld [smem:[#allocation21_spill]] }
  0x16   : > { %2555 = sst [smem:[#allocation20_spill]] %s2554_s12  ;;  %s2071_s18 = smov [#allocation7]  }
  0x17   : > { %s2556_s14 = scalar_select %p2184_p8, 1, 0 }
  0x18   : > { %s244_s19 = sshll.u32 %s2071_s18, 4  ;;  %p1718_p9 = pneg %p2184_p8  ;;  %s245_s19 = int_to_ptr.vmem [resolvable:$true] %s244_s19 }
  0x1a   : > { %p2200_p11 = pnand %p1718_p9, %p2173_p4  ;;  %p2206_p12 = pnand %p1718_p9, %p2163_p1 }
  0x1b   : > { %s2193_s17 = scalar_lea.hbm %s2557_s1, %s2545_s13  ;;  %s1836_s8 = scalar_lea.hbm %s2557_s1, 256 }
  0x1c   : > { %s2559_s21 = scalar_select %p2206_p12, 1, 0 }
  0x1d   : > { %s1831_s22 = scalar_lea.hbm %s2193_s17, 128  ;;  %p1833_p0 = pneg %p2200_p11 }
  0x1e   : > { %p1832_p13 = scmp.ne.s32.totalorder %s2193_s17, %s1831_s22  ;;  %p1837_p7 = scmp.lt.u32.totalorder %s2193_s17, %s2557_s1 }
  0x1f   : > { %p1838_p9 = scmp.lt.u32.totalorder %s1836_s8, %s1831_s22  ;;  %p1840_p6 = scmp.lt.u32.totalorder %s1831_s22, %s2193_s17 }
  0x20   : > { %p1834_p3 = pnand %p1833_p0, %p1832_p13 }
  0x21   : > { %p1839_p10 = por %p1838_p9, %p1837_p7 }
  0x22   : > { %p1835_p5 = pneg %p1834_p3 }
  0x23   : > { %p1841_p1 = por %p1840_p6, %p1839_p10 }
  0x25   : > { %p1842_p4 = pnand %p1841_p1, %p1835_p5 }
  0x27   : > { %1845 = shalt.err (!%p1842_p4)
}
  0x28   : > { %s1846_s18 = scalar_lea.vmem %s245_s19, 128  ;;  %p1854_p2 = scmp.lt.s32.totalorder %s245_s19, %s245_s19 }
  0x29   : > { %p1847_p8 = scmp.ne.s32.totalorder %s245_s19, %s1846_s18  ;;  %p1855_p12 = scmp.lt.s32.totalorder %s1846_s18, %s1846_s18 }
  0x2b   : > { %p1849_p13 = pnand %p1847_p8, %p1833_p0  ;;  %p1856_p7 = por %p1855_p12, %p1854_p2 }
  0x2d   : > { %p1850_p3 = pneg %p1849_p13 }
  0x2f   : > { %p1857_p9 = pnand %p1856_p7, %p1850_p3 }
  0x31   : > { %1860 = shalt.err (!%p1857_p9)
}
  0x32   : > { %1721 = dma.hbm_to_vmem [thread:$0]  (!%p2200_p11), %s2193_s17, 128, %s245_s19, [#allocation8]  }
  0x33   : > { %s2072_s22 = smov [#allocation10]   ;;  %s2073_s30 = smov [#allocation9]  }
  0x34   : > { %s267_s23 = sshll.u32 %s2072_s22, 4  ;;  %s254_s8 = sshll.u32 %s2073_s30, 4  ;;  %s268_s23 = int_to_ptr.vmem [resolvable:$true] %s267_s23  ;;  %s255_s8 = int_to_ptr.vmem [resolvable:$true] %s254_s8 }
  0x35   : > { %s2560_s3 = sld [smem:[#allocation22_spill]]  ;;  %p2561_p2 = scmp.ne.s32.totalorder %s2559_s21, 0 }
  0x37   : > { %p2239_p4 = pneg %p2561_p2 }
  0x3b   : > { %s1861_s13 = scalar_lea.hbm %s2560_s3, 512 }
  0x3c   : > { %p1862_p1 = scmp.ne.s32.totalorder %s2560_s3, %s1861_s13  ;;  %p1868_p10 = scmp.lt.u32.totalorder %s1861_s13, %s2560_s3 }
  0x3e   : > { %p1864_p6 = pnand %p2239_p4, %p1862_p1 }
  0x40   : > { %p1865_p8 = pneg %p1864_p6 }
  0x42   : > { %p1870_p11 = pnand %p1868_p10, %p1865_p8 }
  0x44   : > { %1873 = shalt.err (!%p1870_p11)
}
  0x45   : > { %s1874_s20 = scalar_lea.vmem %s268_s23, 512  ;;  %p1882_p13 = scmp.lt.s32.totalorder %s268_s23, %s268_s23 }
  0x46   : > { %p1875_p12 = scmp.ne.s32.totalorder %s268_s23, %s1874_s20  ;;  %p1883_p3 = scmp.lt.s32.totalorder %s1874_s20, %s1874_s20 }
  0x48   : > { %p1877_p0 = pnand %p1875_p12, %p2239_p4  ;;  %p1884_p7 = por %p1883_p3, %p1882_p13 }
  0x4a   : > { %p1878_p5 = pneg %p1877_p0 }
  0x4c   : > { %p1885_p9 = pnand %p1884_p7, %p1878_p5 }
  0x4e   : > { %1888 = shalt.err (!%p1885_p9)
}
  0x4f   : > { %s2074_s1 = smov 128   ;;  %s2075_s12 = smov 8  }
  0x50   : > { %1727 = dma.hbm_to_vmem [thread:$0]  (!%p2561_p2), %s2560_s3, 512, %s268_s23, [#allocation11], %s2074_s1, %s2074_s1, %s2075_s12  }
  0x51   : > { %s1889_s16 = scalar_lea.hbm %s2533_s2, 512 }
  0x52   : > { %p1890_p1 = scmp.ne.s32.totalorder %s2533_s2, %s1889_s16  ;;  %p1896_p10 = scmp.lt.u32.totalorder %s1889_s16, %s2533_s2 }
  0x54   : > { %p1892_p6 = pnand %p1890_p1, %p2239_p4 }
  0x56   : > { %p1893_p8 = pneg %p1892_p6 }
  0x58   : > { %p1898_p11 = pnand %p1896_p10, %p1893_p8 }
  0x5a   : > { %1901 = shalt.err (!%p1898_p11)
}
  0x5b   : > { %s1902_s13 = scalar_lea.vmem %s255_s8, 512  ;;  %p1910_p13 = scmp.lt.s32.totalorder %s255_s8, %s255_s8 }
  0x5c   : > { %p1903_p12 = scmp.ne.s32.totalorder %s255_s8, %s1902_s13  ;;  %p1911_p3 = scmp.lt.s32.totalorder %s1902_s13, %s1902_s13 }
  0x5e   : > { %p1905_p0 = pnand %p1903_p12, %p2239_p4  ;;  %p1912_p7 = por %p1911_p3, %p1910_p13 }
  0x60   : > { %p1906_p5 = pneg %p1905_p0 }
  0x62   : > { %p1913_p9 = pnand %p1912_p7, %p1906_p5 }
  0x64   : > { %1916 = shalt.err (!%p1913_p9)
}
  0x65   : > { %1724 = dma.hbm_to_vmem [thread:$0]  (!%p2561_p2), %s2533_s2, 512, %s255_s8, [#allocation8], %s2074_s1, %s2074_s1, %s2075_s12  }
  0x66   : > { %s2076_s22 = smov [#allocation12]   ;;  %s1917_s17 = scalar_lea.hbm %s2535_s4, 1024 }
  0x67   : > { %s280_s30 = sshll.u32 %s2076_s22, 4  ;;  %p1918_p1 = scmp.ne.s32.totalorder %s2535_s4, %s1917_s17  ;;  %s281_s30 = int_to_ptr.vmem [resolvable:$true] %s280_s30 }
  0x68   : > { %p1924_p10 = scmp.lt.u32.totalorder %s1917_s17, %s2535_s4 }
  0x69   : > { %p1920_p6 = pnand %p1918_p1, %p2239_p4 }
  0x6b   : > { %p1921_p8 = pneg %p1920_p6 }
  0x6d   : > { %p1926_p11 = pnand %p1924_p10, %p1921_p8 }
  0x6f   : > { %1929 = shalt.err (!%p1926_p11)
}
  0x70   : > { %s1930_s8 = scalar_lea.vmem %s281_s30, 1024  ;;  %p1938_p13 = scmp.lt.s32.totalorder %s281_s30, %s281_s30 }
  0x71   : > { %p1931_p12 = scmp.ne.s32.totalorder %s281_s30, %s1930_s8  ;;  %p1939_p3 = scmp.lt.s32.totalorder %s1930_s8, %s1930_s8 }
  0x73   : > { %p1933_p0 = pnand %p1931_p12, %p2239_p4  ;;  %p1940_p7 = por %p1939_p3, %p1938_p13 }
  0x75   : > { %p1934_p5 = pneg %p1933_p0 }
  0x77   : > { %p1941_p9 = pnand %p1940_p7, %p1934_p5 }
  0x79   : > { %1944 = shalt.err (!%p1941_p9)
}
  0x7a   : > { %1730 = dma.hbm_to_vmem [thread:$0]  (!%p2561_p2), %s2535_s4, 1024, %s281_s30, [#allocation11], %s2074_s1, %s2074_s1, %s2075_s12  }
  0x7b   : > { %s37_s18 = sadd.s32 1, %s2065_s28  ;;  %s46_s21 = sadd.s32 1, %s2057_s26 }
  0x7c   : > { %p39_p4 = scmp.ge.s32.totalorder %s37_s18, 2  ;;  %p53_p1 = scmp.ne.s32.totalorder %s2057_s26, %s2053_s25 }
  0x7d   : > { %p54_p6 = scmp.eq.s32.totalorder %s2069_s29, 0  ;;  %p1742_p8 = scmp.lt.s32.totalorder %s2069_s29, 2 }
  0x7e   : > { %s2580_s18 = smov (%p39_p4, %s37_s18), 0  ;;  %p2563_p11 = scmp.ne.s32.totalorder %s2552_s10, 0 }
  0x7f   : > { %p55_p10 = por %p54_p6, %p53_p1  ;;  %s41_s22 = ssub.s32 %s2065_s28, %s2580_s18 }
  0x80   : > { %p2310_p12 = por %p2563_p11, %p53_p1  ;;  %s300_s15 = sand.u32 1, %s2057_s26  }
  0x81   : > { %p44_p0 = scmp.eq.s32.totalorder %s41_s22, 0  ;;  %s1512_s1 = sshll.u32 %s300_s15, 3 }
  0x82   : > { %s1513_s12 = sshll.u32 %s2065_s28, 7  ;;  %s304_s10 = scalar_lea.vmem [#allocation4], %s1512_s1 }
  0x83   : > { %s2319_s30 = scalar_select %p44_p0, %s2057_s26, %s46_s21  }
  0x84   : > { %s2324_s19 = scalar_lea.hbm %s2531_s0, %s1513_s12  ;;  %s312_s20 = sshll.u32 %s304_s10, 4  ;;  %s2332_s20 = int_to_ptr.vmem [resolvable:$true] %s312_s20 }
  0x85   : > { %p2328_p2 = pnand %p1742_p8, %p55_p10  ;;  %s301_s8 = scalar_lea.sflag [#allocation5], %s300_s15 }
  0x86   : > { %s1945_s3 = scalar_lea.hbm %s2324_s19, 128  ;;  %s1950_s22 = scalar_lea.hbm %s2531_s0, 256 }
  0x87   : > { %p1946_p5 = scmp.ne.s32.totalorder %s2324_s19, %s1945_s3  ;;  %p1947_p13 = pneg %p2328_p2 }
  0x88   : > { %p1951_p9 = scmp.lt.u32.totalorder %s2324_s19, %s2531_s0  ;;  %p1952_p4 = scmp.lt.u32.totalorder %s1950_s22, %s1945_s3 }
  0x89   : > { %p1948_p3 = pnand %p1947_p13, %p1946_p5  ;;  %p1954_p6 = scmp.lt.u32.totalorder %s1945_s3, %s2324_s19 }
  0x8a   : > { %p1953_p1 = por %p1952_p4, %p1951_p9 }
  0x8b   : > { %p1949_p7 = pneg %p1948_p3 }
  0x8c   : > { %p1955_p8 = por %p1954_p6, %p1953_p1 }
  0x8e   : > { %p1956_p10 = pnand %p1955_p8, %p1949_p7 }
  0x90   : > { %1959 = shalt.err (!%p1956_p10)
}
  0x91   : > { %s1960_s15 = scalar_lea.vmem %s2332_s20, 128  ;;  %s2077_s16 = smov [#allocation4]  }
  0x92   : > { %p1961_p11 = scmp.ne.s32.totalorder %s2332_s20, %s1960_s15  ;;  %s1965_s17 = sshll.u32 %s2077_s16, 4  ;;  %s1966_s17 = int_to_ptr.vmem [resolvable:$false] %s1965_s17 }
  0x93   : > { %s1967_s10 = scalar_lea.vmem %s1966_s17, 256  ;;  %p1968_p3 = scmp.lt.s32.totalorder %s2332_s20, %s1966_s17 }
  0x94   : > { %p1963_p0 = pnand %p1961_p11, %p1947_p13  ;;  %p1969_p9 = scmp.lt.s32.totalorder %s1967_s10, %s1960_s15 }
  0x96   : > { %p1964_p5 = pneg %p1963_p0  ;;  %p1970_p4 = por %p1969_p9, %p1968_p3 }
  0x98   : > { %p1971_p1 = pnand %p1970_p4, %p1964_p5 }
  0x9a   : > { %1974 = shalt.err (!%p1971_p1)
}
  0x9b   : > { %1734 = dma.hbm_to_vmem [thread:$0]  (!%p2328_p2), %s2324_s19, 128, %s2332_s20, %s301_s8  }
  0x9c   : > { %p2566_p7 = scmp.ne.s32.totalorder %s2556_s14, 0 }
  0x9d   : > { %s2362_s3 = sand.u32 (!%p2566_p7), 1, %s2053_s25   ;;  %p2567_p13 = scmp.ne.s32.totalorder (!%p2566_p7), %s2553_s11, 0 }
  0x9e   : > { %321 = sbr.rel (%p2566_p7) target bundleno = 1899 (0x76b), region = 48  ;;  %s1515_s24 = sshll.u32 (!%p2566_p7), %s2362_s3, 3 }
  0x9f   : > { %s324_s21 = scalar_lea.sflag (!%p2566_p7), [#allocation5], %s2362_s3  ;;  %s2368_s22 = scalar_lea.vmem (!%p2566_p7), [#allocation4], %s1515_s24 }
  0xa5   : > { %2028 = dma.done.wait (%p2567_p13), %s324_s21, 128  }
  0xa6   : > { %2030 = vsyncadd (%p2567_p13), %s324_s21, 4294967168 }
  0xa7   : > { %2032 = dma.done.wait (%p2567_p13), [#allocation8], 128  }
  0xa8   : > { %2034 = vsyncadd (%p2567_p13), [#allocation8], 4294967168  ;;  %p2568_p2 = scmp.ne.s32.totalorder %s2551_s9, 0 }
  0xaa   : > { %2036 = dma.done.wait (%p2568_p2), [#allocation8], 512  }
  0xab   : > { %2038 = vsyncadd (%p2568_p2), [#allocation8], 4294966784 }
  0xac   : > { %2040 = dma.done.wait (%p2568_p2), [#allocation11], 1536  }
  0xad   : > { %2042 = vsyncadd (%p2568_p2), [#allocation11], 4294965760  ;;  %v2078_v0 = vmov 0.0|0.0   ;;  %vm2079_vm0 = vmmov 0   ;;  %v2080_v1 = vmov 0.0   ;;  %v379_v2 = vld [vmem:[#allocation10] sm:$0xff]  ;;  %v613_v26 = vlaneseq }
  0xae   : > { %1664 = vmatprep.subr.bf16.mxu1 %v2078_v0  ;;  %1583 = vmatprep.mubr.msk.f32.mxu1 %vm2079_vm0, %v2080_v1  ;;  %v380_v3 = vld [vmem:[#allocation10 + $0x8] sm:$0xff]  ;;  %v381_v4 = vld [vmem:[#allocation10 + $0x10] sm:$0xff]  ;;  %v382_v6 = vld [vmem:[#allocation10 + $0x18] sm:$0xff]  ;;  %vm383_vm1 = vcmask 261120   ;;  %vm458_vm2 = vcmask 523264   ;;  %s2081_s14 = smov 96  }
  0xaf   : > { %1676 = vmatprep.subr.bf16.mxu0 %v2078_v0  ;;  %1601 = vmatprep.mubr.msk.f32.mxu0 %vm2079_vm0, %v2080_v1  ;;  %v1665_v5 = vpack.c.bf16 %v380_v3, %v379_v2  ;;  %v1668_v7 = vpack.c.bf16 %v382_v6, %v381_v4  ;;  %v522_v8 = vld [vmem:[#allocation9] sm:$0xff]  ;;  %v523_v9 = vld [vmem:[#allocation9 + $0x8] sm:$0xff]  ;;  %v378_v10 = vld [vmem:[#allocation7] sm:$0xff]  ;;  %v614_v28 = vshrl.u32 %v613_v26, 7  ;;  %s2082_s19 = smov 112   ;;  %s2083_s20 = smov 80  }
  0xb0   : > { %v1671_v11 = vpack.c.bf16 %v523_v9, %v522_v8  ;;  %v524_v12 = vld [vmem:[#allocation9 + $0x10] sm:$0xff]  ;;  %v525_v13 = vld [vmem:[#allocation9 + $0x18] sm:$0xff]  ;;  %v610_v29 = vld [vmem:[%s2536_s5] sm:$0x1]  ;;  %vm507_vm3 = vcmask 64512   ;;  %vm621_vm4 = vcmask 130048  }
  0xb1   : > { %1666 = vmatpush3.bf16.msra.mxu1 %v1665_v5  ;;  %v1674_v14 = vpack.c.bf16 %v525_v13, %v524_v12  ;;  %v521_v15 = vld [vmem:[%s2368_s22] sm:$0xff]  ;;  %v611_v30 = vmul.f32 0.25, %v610_v29  ;;  %v615_v31 = vsub.s32 0, %v614_v28  ;;  %v1521_v41 = vld [vmem:[%s2537_s6] ss:$0 sm:$0xff]  ;;  %s2084_s1 = smov 64  }
  0xb2   : > { %1667 = vmatprep.subr.bf16.mxu1 %v2078_v0  ;;  %s2085_s12 = smov 16   ;;  %s2086_s15 = smov 32   ;;  %vm1285_vm5 = vcmask 392192  }
  0xb3   : > { %v616_v32 = vrot.slane %v611_v30, %v615_v31  ;;  %s2087_s16 = smov 48   ;;  %s373_s17 = scalar_lea.vmem [#allocation13], %s1515_s24 }
  0xb4   : > { %s1384_s10 = sshll.u32 %s373_s17, 4  ;;  %s2569_s21 = sshll.u32 %s2061_s27, 7  ;;  %s2477_s10 = int_to_ptr.vmem [resolvable:$true] %s1384_s10 }
  0xb5   : > { %1669 = vmatpush3.bf16.msra.mxu1 %v1668_v7  ;;  %s2484_s11 = scalar_lea.hbm %s2538_s7, %s2569_s21  ;;  %s2088_s24 = smov [#allocation13]  }
  0xb6   : > { %1670 = vmatprep.subr.bf16.mxu1 %v2078_v0 }
  0xb8   : > { %1584 = vmatmul.mubr.msk.f32.vlgmr.msra.gmra.mrb[0].mxu1 %vm383_vm1, %v378_v10 }
  0xb9   : > { %1672 = vmatpush3.bf16.msra.mxu1 %v1671_v11  ;;  %1594 = vmatprep.mubr.msk.f32.mxu1 %vm2079_vm0, %v2080_v1 }
  0xba   : > { %1673 = vmatprep.subr.bf16.mxu1 %v2078_v0 }
  0xbd   : > { %1675 = vmatpush3.bf16.msra.mxu1 %v1674_v14 }
  0xbe   : > { %1604 = vmatprep.subr.mxu1 %v2080_v1 }
  0xc0   : > { %1595 = vmatmul.mubr.msk.f32.vlgmr.msra.gmra.mrb[2].mxu1 %vm383_vm1, %v521_v15 }
  0xc1   : > { %1606 = vmatprep.mubr.msk.f32.mxu1 %vm2079_vm0, %v2080_v1 }
 0x18b   : > { %v2403_v16 = vpop.f32.mrb[0].mxu1 }
 0x18c   : > { %v1585_v17 = vpop.f32.mrb[1].mxu1  ;;  %v457_v22 = vmul.f32 %v2403_v16, %v2403_v16 }
 0x18e   : > { %v459_v23 = vsel %vm458_vm2, %v457_v22, 0.0 }
 0x193   : > { %v596_v18 = vpop.f32.mrb[2].mxu1 }
 0x194   : > { %v1596_v19 = vpop.f32.mrb[3].mxu1  ;;  %v600_v20 = vmul.f32 %v596_v18, %v596_v18 }
 0x196   : > { %v602_v21 = vsel %vm458_vm2, %v600_v20, 0.0 }
 0x197   : > { %603 = vadd.xlane.f32.xlu0 %v602_v21 }
 0x19b   : > { %460 = vadd.xlane.f32.xlu0 %v459_v23 }
 0x224   : > { %v604_v24 = vpop.xlane.xlu0 %603 }
 0x225   : > { %v606_v25 = vmul.f32 0.015625, %v604_v24 }
 0x227   : > { %v607_v27 = vadd.f32 1e-06, %v606_v25 }
 0x228   : > { %v461_v36 = vpop.xlane.xlu0 %460 }
 0x229   : > { %1811 = vrsqrt.f32 %v607_v27  ;;  %v463_v37 = vmul.f32 0.015625, %v461_v36 }
 0x22b   : > { %v464_v38 = vadd.f32 1e-06, %v463_v37 }
 0x22d   : > { %1813 = vrsqrt.f32 %v464_v38 }
 0x233   : > { %v1812_v33 = vpop.eup %1811 }
 0x234   : > { %v609_v34 = vmul.f32 %v1812_v33, %v596_v18 }
 0x236   : > { %v618_v35 = vmul.f32 %v616_v32, %v609_v34 }
 0x237   : > { %v1814_v39 = vpop.eup %1813 }
 0x238   : > { %947 = vrot.lane.b32.xlu0 %v618_v35, %s2081_s14  ;;  %783 = vrot.lane.b32.xlu1 %v618_v35, %s2082_s19  ;;  %v466_v40 = vmul.f32 %v1814_v39, %v2403_v16 }
 0x23a   : > { %v474_v42 = vmul.f32 %v1521_v41, %v466_v40 }
 0x23c   : > { %1110 = vrot.lane.b32.xlu0 %v618_v35, %s2083_s20 }
 0x261   : > { %475 = vxpose.xlu1.b32.start.end [1/1] (short) (narrow) %v474_v42, 64 }
 0x2aa   : > { %v784_v43 = vpop.permute.xlu1 %783  ;;  %v948_v61 = vpop.permute.xlu0 %947 }
 0x2ae   : > { %v1111_v3 = vpop.permute.xlu0 %1110 }
 0x2e1   : > { %v491_v44 = vpop.trf.xlu1 }
 0x2e2   : > { %508 = vst.msk [vmem:[#allocation2] sm:$0xff] %vm507_vm3, %v491_v44 }
 0x2e5   : > { %v492_v45 = vpop.trf.xlu1 }
 0x2e6   : > { %509 = vst.msk [vmem:[#allocation2 + $0x8] sm:$0xff] %vm507_vm3, %v492_v45 }
 0x2e9   : > { %v493_v46 = vpop.trf.xlu1  ;;  %v619_v48 = vld [vmem:[#allocation2] sm:$0xff] }
 0x2ea   : > { %510 = vst.msk [vmem:[#allocation2 + $0x10] sm:$0xff] %vm507_vm3, %v493_v46 }
 0x2ed   : > { %v494_v47 = vpop.trf.xlu1  ;;  %v620_v49 = vld [vmem:[#allocation2 + $0x8] sm:$0xff] }
 0x2ee   : > { %511 = vst.msk [vmem:[#allocation2 + $0x18] sm:$0xff] %vm507_vm3, %v494_v47  ;;  %v1677_v50 = vpack.c.bf16 %v620_v49, %v619_v48 }
 0x2f0   : > { %1678 = vmatpush3.bf16.msra.mxu0 %v1677_v50 }
 0x2f1   : > { %v495_v51 = vpop.trf.xlu1  ;;  %1679 = vmatprep.subr.bf16.mxu0 %v2078_v0  ;;  %v781_v53 = vld [vmem:[#allocation2 + $0x10] sm:$0xff] }
 0x2f2   : > { %512 = vst.msk [vmem:[#allocation2 + $0x20] sm:$0xff] %vm507_vm3, %v495_v51 }
 0x2f3   : > { %1602 = vmatmul.mubr.msk.f32.vlgmr.msra.gmra.mrb[0].mxu0 %vm621_vm4, %v618_v35 }
 0x2f4   : > { %1613 = vmatprep.mubr.msk.f32.mxu0 %vm2079_vm0, %v2080_v1 }
 0x2f5   : > { %v496_v52 = vpop.trf.xlu1  ;;  %v782_v54 = vld [vmem:[#allocation2 + $0x18] sm:$0xff] }
 0x2f6   : > { %513 = vst.msk [vmem:[#allocation2 + $0x28] sm:$0xff] %vm507_vm3, %v496_v52  ;;  %v1680_v55 = vpack.c.bf16 %v782_v54, %v781_v53  ;;  %v1287_v53 = vld [vmem:[#allocation12] sm:$0xff]  ;;  %v1288_v54 = vld [vmem:[#allocation12 + $0x8] sm:$0xff] }
 0x2f8   : > { %1681 = vmatpush3.bf16.msra.mxu0 %v1680_v55  ;;  %v1289_v55 = vld [vmem:[#allocation12 + $0x10] sm:$0xff] }
 0x2f9   : > { %v497_v56 = vpop.trf.xlu1  ;;  %1682 = vmatprep.subr.bf16.mxu0 %v2078_v0  ;;  %v945_v58 = vld [vmem:[#allocation2 + $0x20] sm:$0xff] }
 0x2fa   : > { %514 = vst.msk [vmem:[#allocation2 + $0x30] sm:$0xff] %vm507_vm3, %v497_v56  ;;  %v1689_v56 = vpack.c.bf16 %v1288_v54, %v1287_v53 }
 0x2fb   : > { %1614 = vmatmul.mubr.msk.f32.vlgmr.msra.gmra.mrb[2].mxu0 %vm621_vm4, %v784_v43 }
 0x2fc   : > { %1625 = vmatprep.mubr.msk.f32.mxu0 %vm2079_vm0, %v2080_v1 }
 0x2fd   : > { %v498_v57 = vpop.trf.xlu1  ;;  %v946_v59 = vld [vmem:[#allocation2 + $0x28] sm:$0xff] }
 0x2fe   : > { %515 = vst.msk [vmem:[#allocation2 + $0x38] sm:$0xff] %vm507_vm3, %v498_v57  ;;  %v1683_v60 = vpack.c.bf16 %v946_v59, %v945_v58  ;;  %v1290_v57 = vld [vmem:[#allocation12 + $0x18] sm:$0xff] }
 0x2ff   : > { %v1692_v58 = vpack.c.bf16 %v1290_v57, %v1289_v55 }
 0x300   : > { %1684 = vmatpush3.bf16.msra.mxu0 %v1683_v60 }
 0x301   : > { %1685 = vmatprep.subr.bf16.mxu0 %v2078_v0  ;;  %v1108_v62 = vld [vmem:[#allocation2 + $0x30] sm:$0xff] }
 0x303   : > { %1626 = vmatmul.mubr.msk.f32.vlgmr.msra.gmra.mrb[4].mxu0 %vm621_vm4, %v948_v61  ;;  %v1291_v61 = vld [vmem:[#allocation12 + $0x20] sm:$0xff] }
 0x304   : > { %1637 = vmatprep.mubr.msk.f32.mxu0 %vm2079_vm0, %v2080_v1 }
 0x305   : > { %v1109_v63 = vld [vmem:[#allocation2 + $0x38] sm:$0xff] }
 0x306   : > { %v1686_v2 = vpack.c.bf16 %v1109_v63, %v1108_v62  ;;  %v1292_v62 = vld [vmem:[#allocation12 + $0x28] sm:$0xff]  ;;  %v1293_v63 = vld [vmem:[#allocation12 + $0x30] sm:$0xff] }
 0x308   : > { %1687 = vmatpush3.bf16.msra.mxu0 %v1686_v2  ;;  %v1294_v2 = vld [vmem:[#allocation12 + $0x38] sm:$0xff] }
 0x309   : > { %1688 = vmatprep.subr.bf16.mxu0 %v2078_v0 }
 0x30b   : > { %1638 = vmatmul.mubr.msk.f32.vlgmr.msra.gmra.mrb[6].mxu0 %vm621_vm4, %v1111_v3  ;;  %v1698_v3 = vpack.c.bf16 %v1294_v2, %v1293_v63 }
 0x30c   : > { %1661 = vmatprep.mubr.msk.f32.mxu0 %vm2079_vm0, %v2080_v1  ;;  %1690 = vmatpush3.bf16.msra.mxu0 %v1689_v56 }
 0x30d   : > { %1691 = vmatprep.subr.bf16.mxu0 %v2078_v0 }
 0x310   : > { %1693 = vmatpush3.bf16.msra.mxu0 %v1692_v58 }
 0x311   : > { %1694 = vmatprep.subr.bf16.mxu0 %v2078_v0 }
 0x3c6   : > { %v691_v4 = vpop.f32.mrb[0].mxu0 }
 0x3c7   : > { %v1603_v5 = vpop.f32.mrb[1].mxu0  ;;  %v696_v6 = vsel %vm507_vm3, %v691_v4, -inf }
 0x3c8   : > { %697 = vmax.xlane.f32.xlu0 %v696_v6 }
 0x3ce   : > { %v853_v7 = vpop.f32.mrb[2].mxu0 }
 0x3cf   : > { %v1615_v8 = vpop.f32.mrb[3].mxu0  ;;  %v857_v9 = vsel %vm507_vm3, %v853_v7, -inf }
 0x3d0   : > { %858 = vmax.xlane.f32.xlu1 %v857_v9 }
 0x3d6   : > { %v1017_v10 = vpop.f32.mrb[4].mxu0 }
 0x3d7   : > { %v1627_v11 = vpop.f32.mrb[5].mxu0  ;;  %v1021_v12 = vsel %vm507_vm3, %v1017_v10, -inf }
 0x3d8   : > { %1022 = vmax.xlane.f32.xlu0 %v1021_v12 }
 0x3de   : > { %v1180_v13 = vpop.f32.mrb[6].mxu0 }
 0x3df   : > { %v1639_v14 = vpop.f32.mrb[7].mxu0  ;;  %v1184_v15 = vsel %vm507_vm3, %v1180_v13, -inf }
 0x3e0   : > { %1185 = vmax.xlane.f32.xlu0 %v1184_v15 }
 0x3f6   : > { %517 = vrot.lane.b32.xlu0 %v2403_v16, %s2084_s1 }
 0x455   : > { %v698_v17 = vpop.xlane.xlu0 %697 }
 0x456   : > { %v699_v18 = vsub.f32 %v691_v4, %v698_v17 }
 0x458   : > { %v700_v19 = vmul.f32 1.442695, %v699_v18 }
 0x45a   : > { %1815 = vpow2.f32 %v700_v19 }
 0x45d   : > { %v859_v16 = vpop.xlane.xlu1 %858 }
 0x45e   : > { %v860_v26 = vsub.f32 %v853_v7, %v859_v16 }
 0x460   : > { %v861_v27 = vmul.f32 1.442695, %v860_v26 }
 0x462   : > { %1817 = vpow2.f32 %v861_v27 }
 0x464   : > { %v1816_v20 = vpop.eup %1815 }
 0x465   : > { %v702_v21 = vsel %vm507_vm3, %v1816_v20, 0.0  ;;  %v1023_v22 = vpop.xlane.xlu0 %1022 }
 0x466   : > { %703 = vadd.xlane.f32.xlu0 %v702_v21  ;;  %v1024_v28 = vsub.f32 %v1017_v10, %v1023_v22 }
 0x468   : > { %v1025_v29 = vmul.f32 1.442695, %v1024_v28 }
 0x46a   : > { %1819 = vpow2.f32 %v1025_v29 }
 0x46c   : > { %v1818_v32 = vpop.eup %1817 }
 0x46d   : > { %v1186_v23 = vpop.xlane.xlu0 %1185  ;;  %v863_v33 = vsel %vm507_vm3, %v1818_v32, 0.0 }
 0x46e   : > { %v1187_v30 = vsub.f32 %v1180_v13, %v1186_v23 }
 0x470   : > { %v1188_v31 = vmul.f32 1.442695, %v1187_v30 }
 0x471   : > { %v518_v24 = vpop.permute.xlu0 %517 }
 0x472   : > { %520 = vst.msk [vmem:[#allocation3] sm:$0xff] %vm458_vm2, %v518_v24  ;;  %1821 = vpow2.f32 %v1188_v31 }
 0x474   : > { %v1820_v34 = vpop.eup %1819 }
 0x475   : > { %v1027_v35 = vsel %vm507_vm3, %v1820_v34, 0.0 }
 0x479   : > { %v707_v25 = vld [vmem:[#allocation3] sm:$0xff] }
 0x47a   : > { %869 = vrot.lane.b32.xlu1 %v707_v25, %s2082_s19  ;;  %1605 = vmatpush3.msra.mxu1 %v707_v25  ;;  %s1975_s19 = scalar_lea.vmem %s2477_s10, 128 }
 0x47b   : > { %1616 = vmatprep.subr.mxu1 %v2080_v1  ;;  %p1976_p6 = scmp.ne.s32.totalorder %s2477_s10, %s1975_s19 }
 0x47c   : > { %1032 = vrot.lane.b32.xlu0 %v707_v25, %s2081_s14  ;;  %v1822_v36 = vpop.eup %1821  ;;  %s1370_s14 = scalar_lea.sflag [#allocation6], %s2362_s3 }
 0x47d   : > { %v1190_v37 = vsel %vm507_vm3, %v1822_v36, 0.0  ;;  %p1977_p8 = pnand %p1976_p6, %p2310_p12 }
 0x47f   : > { %p1978_p10 = pneg %p1977_p8 }
 0x49e   : > { %864 = vadd.xlane.f32.xlu1 %v863_v33 }
 0x4a2   : > { %1028 = vadd.xlane.f32.xlu1 %v1027_v35 }
 0x4a6   : > { %1191 = vadd.xlane.f32.xlu1 %v1190_v37 }
 0x4b7   : > { %1195 = vrot.lane.b32.xlu1 %v707_v25, %s2083_s20  ;;  %s1979_s20 = sshll.u32 %s2088_s24, 4  ;;  %s1980_s20 = int_to_ptr.vmem [resolvable:$false] %s1979_s20 }
 0x4b8   : > { %s1981_s27 = scalar_lea.vmem %s1980_s20, 256  ;;  %p1982_p11 = scmp.lt.s32.totalorder %s2477_s10, %s1980_s20 }
 0x4b9   : > { %p1983_p0 = scmp.lt.s32.totalorder %s1981_s27, %s1975_s19 }
 0x4bb   : > { %p1984_p5 = por %p1983_p0, %p1982_p11 }
 0x4bd   : > { %p1985_p3 = pnand %p1984_p5, %p1978_p10 }
 0x4ec   : > { %v870_v41 = vpop.permute.xlu1 %869 }
 0x4f3   : > { %v704_v38 = vpop.xlane.xlu0 %703 }
 0x4f4   : > { %1823 = vrcp.f32 %v704_v38 }
 0x4f7   : > { %v1033_v47 = vpop.permute.xlu0 %1032 }
 0x4fe   : > { %v1824_v39 = vpop.eup %1823 }
 0x4ff   : > { %v706_v40 = vmul.f32 %v1824_v39, %v1816_v20 }
 0x501   : > { %1607 = vmatmul.mubr.msk.f32.vlgmr.msra.gmra.mrb[4].mxu1 %vm507_vm3, %v706_v40 }
 0x502   : > { %1617 = vmatpush3.msra.mxu1 %v870_v41  ;;  %1618 = vmatprep.mubr.msk.f32.mxu1 %vm2079_vm0, %v2080_v1 }
 0x503   : > { %1628 = vmatprep.subr.mxu1 %v2080_v1 }
 0x52b   : > { %v865_v42 = vpop.xlane.xlu1 %864 }
 0x52c   : > { %1825 = vrcp.f32 %v865_v42 }
 0x52f   : > { %v1029_v43 = vpop.xlane.xlu1 %1028 }
 0x530   : > { %1827 = vrcp.f32 %v1029_v43 }
 0x533   : > { %v1192_v44 = vpop.xlane.xlu1 %1191 }
 0x534   : > { %1829 = vrcp.f32 %v1192_v44 }
 0x536   : > { %v1826_v45 = vpop.eup %1825 }
 0x537   : > { %v867_v46 = vmul.f32 %v1826_v45, %v1818_v32  ;;  %v1196_v50 = vpop.permute.xlu1 %1195 }
 0x539   : > { %1619 = vmatmul.mubr.msk.f32.vlgmr.msra.gmra.mrb[6].mxu1 %vm507_vm3, %v867_v46 }
 0x53a   : > { %v1828_v48 = vpop.eup %1827  ;;  %1629 = vmatpush3.msra.mxu1 %v1033_v47  ;;  %1630 = vmatprep.mubr.msk.f32.mxu1 %vm2079_vm0, %v2080_v1 }
 0x53b   : > { %v1031_v49 = vmul.f32 %v1828_v48, %v1820_v34  ;;  %1640 = vmatprep.subr.mxu1 %v2080_v1 }
 0x53d   : > { %1631 = vmatmul.mubr.msk.f32.vlgmr.msra.gmra.mrb[8].mxu1 %vm507_vm3, %v1031_v49 }
 0x53e   : > { %v1830_v51 = vpop.eup %1829  ;;  %1641 = vmatpush3.msra.mxu1 %v1196_v50  ;;  %1642 = vmatprep.mubr.msk.f32.mxu1 %vm2079_vm0, %v2080_v1  ;;  %v1695_v1 = vpack.c.bf16 %v1292_v62, %v1291_v61 }
 0x53f   : > { %v1194_v52 = vmul.f32 %v1830_v51, %v1822_v36 }
 0x540   : > { %1696 = vmatpush3.bf16.msra.mxu0 %v1695_v1 }
 0x541   : > { %1643 = vmatmul.mubr.msk.f32.vlgmr.msra.gmra.mrb[10].mxu1 %vm507_vm3, %v1194_v52  ;;  %1697 = vmatprep.subr.bf16.mxu0 %v2078_v0 }
 0x544   : > { %1699 = vmatpush3.bf16.msra.mxu0 %v1698_v3 }
 0x5d4   : > { %v777_v59 = vpop.f32.mrb[4].mxu1 }
 0x5d5   : > { %v1608_v60 = vpop.f32.mrb[5].mxu1 }
 0x60c   : > { %v941_v4 = vpop.f32.mrb[6].mxu1 }
 0x60d   : > { %1272 = vrot.lane.b32.xlu1 %v941_v4, %s2085_s12  ;;  %v1620_v5 = vpop.f32.mrb[7].mxu1 }
 0x610   : > { %v1104_v6 = vpop.f32.mrb[8].mxu1 }
 0x611   : > { %1276 = vrot.lane.b32.xlu0 %v1104_v6, %s2086_s15  ;;  %v1632_v7 = vpop.f32.mrb[9].mxu1 }
 0x614   : > { %v1267_v8 = vpop.f32.mrb[10].mxu1 }
 0x615   : > { %1280 = vrot.lane.b32.xlu1 %v1267_v8, %s2087_s16  ;;  %v1644_v9 = vpop.f32.mrb[11].mxu1 }
 0x67f   : > { %v1273_v0 = vpop.permute.xlu1 %1272 }
 0x680   : > { %v1283_v11 = vsel %vm621_vm4, %v777_v59, %v1273_v0 }
 0x683   : > { %v1277_v10 = vpop.permute.xlu0 %1276 }
 0x684   : > { %v1284_v12 = vsel %vm383_vm1, %v1283_v11, %v1277_v10 }
 0x687   : > { %v1281_v13 = vpop.permute.xlu1 %1280 }
 0x688   : > { %v1286_v14 = vsel %vm1285_vm5, %v1284_v12, %v1281_v13 }
 0x689   : > { %1662 = vmatmul.mubr.msk.f32.vlgmr.msra.gmra.mrb[8].mxu0 %vm458_vm2, %v1286_v14 }
 0x75c   : > { %v1364_v15 = vpop.f32.mrb[8].mxu0 }
 0x75d   : > { %1368 = vst [vmem:[%s373_s17] sm:$0xff] %v1364_v15  ;;  %v1663_v17 = vpop.f32.mrb[9].mxu0 }
 0x75e   : > { %1988 = shalt.err (!%p1985_p3)
}
 0x75f   : > { %s1989_s3 = scalar_lea.hbm %s2484_s11, 128  ;;  %s1993_s1 = scalar_lea.hbm %s2538_s7, 256 }
 0x760   : > { %p1990_p9 = scmp.ne.s32.totalorder %s2484_s11, %s1989_s3  ;;  %p1994_p7 = scmp.lt.u32.totalorder %s2484_s11, %s2538_s7 }
 0x761   : > { %p1995_p13 = scmp.lt.u32.totalorder %s1993_s1, %s1989_s3  ;;  %p1997_p6 = scmp.lt.u32.totalorder %s1989_s3, %s2484_s11 }
 0x762   : > { %p1991_p4 = pnand %p1990_p9, %p2310_p12 }
 0x763   : > { %p1996_p2 = por %p1995_p13, %p1994_p7 }
 0x764   : > { %p1992_p1 = pneg %p1991_p4 }
 0x765   : > { %p1998_p8 = por %p1997_p6, %p1996_p2 }
 0x767   : > { %p1999_p10 = pnand %p1998_p8, %p1992_p1 }
 0x769   : > { %2002 = shalt.err (!%p1999_p10)
}
 0x76a   : > { %1716 = dma.vmem_to_hbm [thread:$0]  (%p2310_p12), %s2477_s10, 128, %s2484_s11, %s1370_s14  }
 0x76b PF: > { %s2570_s16 = sld [smem:[#allocation19_spill]]  ;;  %s2571_s17 = sld [smem:[#allocation20_spill]] }
 0x76c   : > { %p2573_p0 = scmp.ge.s32.totalorder %s2069_s29, 2 }
 0x771   : > { %s1396_s21 = sand.u32 1, %s2570_s16   ;;  %p2572_p11 = scmp.ne.s32.totalorder %s2571_s17, 0 }
 0x772   : > { %s1397_s22 = scalar_lea.sflag [#allocation6], %s1396_s21 }
 0x773   : > { %p1736_p5 = pnand %p2573_p0, %p2572_p11 }
 0x775   : > { %2044 = dma.done.wait (!%p1736_p5), %s1397_s22, 128  }
 0x776   : > { %2046 = vsyncadd (!%p1736_p5), %s1397_s22, 4294967168  ;;  %s25_s29 = sadd.s32 1, %s2069_s29   ;;  %s2574_s24 = smov %s2053_s25 }
 0x777   : > { %p22_p3 = scmp.ge.s32.totalorder %s25_s29, 4   ;;  %s2575_s25 = smov %s2057_s26 }
 0x778   : > { %s2576_s26 = smov %s2319_s30  ;;  %s2577_s27 = smov %s2065_s28 }
 0x779   : > { %s2578_s28 = smov %s2580_s18  ;;  %24 = sbr.rel (!%p22_p3) target bundleno = 11 (0xb), region = 114 }
 0x780   :  { %1402 = vsyncpa [#allocation5], 1 }
 0x781   :  { %1404 = vsyncpa [#allocation5 + $0x1], 1 }
 0x782   :  { %1405 = vsyncpa [#allocation8], 1 }
 0x783   :  { %1406 = vsyncpa [#allocation11], 1 }
 0x784   :  { %1407 = vsyncpa [#allocation6], 1 }
 0x785   :  { %1409 = vsyncpa [#allocation6 + $0x1], 1 }

</bundles_post_ra>
